<compile_context>
chip_gen: v5e
topology: v5e:2x2
jax: 0.10.0
libtpu: 0.0.40
codegen_flags: <defaults>
</compile_context>

<pallas_src>
import functools

import jax
import jax.numpy as jnp
from jax.experimental import pallas as pl
from jax.experimental.pallas import tpu as pltpu

NEG_SLOPE = 0.2      # PyG GATConv default negative_slope
MASK_VAL = -1e30     # finite "-inf" for masked (non-edge) attention logits


def _round_up(n, m):
    return ((n + m - 1) // m) * m


def _vmem_caps():
    """(physical VMEM bytes, soft cap we allow ourselves to request)."""
    try:
        phys = pltpu.get_tpu_info().vmem_capacity_bytes
    except Exception:
        phys = 64 * 1024 * 1024
    if phys >= (100 << 20):          # v5e / v6e: 128 MiB parts -> use most of it
        return phys, 100 << 20
    return phys, 52 << 20            # v7x: 64 MiB -> leave ~12 MiB headroom


def _tile_cap():
    """Generation-aware dst-row tile cap (v7x: 64 MiB VMEM -> smaller tile)."""
    phys, _ = _vmem_caps()
    return 256 if phys >= (100 << 20) else 128


def _bf16_eup():
    """bf16 EUP exp exists on v6e / v7x; keep f32 on v5e / unknown chips."""
    try:
        info = pltpu.get_tpu_info()
        s = " ".join(str(getattr(info, a, "")) for a in
                     ("chip_version", "version", "generation", "name")).lower()
        return ("v6" in s) or ("v7" in s) or ("6e" in s) or ("7x" in s)
    except Exception:
        return False


def _choose_tiling(n):
    cap = _tile_cap()
    if n <= cap:
        tm = _round_up(n, 8)
        return tm, tm
    return cap, _round_up(n, cap)


def _proj_vmem_bytes(n, fin, tm, hc, h2, soft_cap):
    step = (2 * tm * fin * 4       # x tile (f32, double-buffered)
            + 2 * fin * hc * 2     # packed W (bf16)
            + 2 * fin * h2 * 2     # composed attention weights (bf16)
            + 2 * tm * hc * 2      # xp tile out (bf16)
            + 2 * tm * h2 * 4      # a_all tile out (f32)
            + tm * hc * 4)         # f32 matmul accumulator before downcast
    return int(min(max(step + (4 << 20), 16 << 20), soft_cap))


def _attn_vmem_bytes(n, tm, h, c, out_dim, soft_cap):
    hc = h * c
    step = (2 * tm * h * 4         # a_dst tile
            + 2 * h * n * 4        # a_srcT (layer-invariant; assume 2 buffers)
            + 2 * n * hc * 2       # xp (bf16, layer-invariant; assume 2 buffers)
            + 2 * tm * n * 1       # adjacency tile (int8, double-buffered)
            + 2 * out_dim * 4      # bias
            + 2 * tm * out_dim * 4  # out tile
            + 4 * tm * n * 4)      # e / p / additive-mask intermediates (f32)
    return int(min(max(step + (4 << 20), 32 << 20), soft_cap))


# ------------------------------ kernels ------------------------------------ #

def _project_kernel(x_ref, wp_ref, attw_ref, xp_ref, a_ref):
    """Per-row-tile source projection: xp = x@Wp (bf16) and a_all = x@[adst|asrc]."""
    xb = x_ref[...].astype(jnp.bfloat16)                      # [TM, Fin]
    xp_ref[...] = jnp.dot(xb, wp_ref[...],
                          preferred_element_type=jnp.float32).astype(jnp.bfloat16)
    a_ref[...] = jnp.dot(xb, attw_ref[...],
                         preferred_element_type=jnp.float32)  # [TM, 2H]


def _gat_attn_kernel(a_dst_ref, a_srcT_ref, xp_ref, mask_ref, bias_ref, out_ref, *,
                     heads, head_dim, concat, apply_elu, apply_log_softmax, bf16_exp):
    H, C = heads, head_dim
    a_dst = a_dst_ref[...]                                    # [TM, H] f32
    a_srcT = a_srcT_ref[...]                                  # [H, N]  f32
    xp = xp_ref[...]                                          # [N, H*C] bf16
    # int8 adjacency -> additive -inf bias built on-chip (halves HBM vs bf16 mask).
    mask_add = jnp.where(mask_ref[...] > 0,
                         jnp.float32(0.0), jnp.float32(MASK_VAL))   # [TM, N]

    segs = []
    acc = None
    for h in range(H):                                        # static unroll over heads
        e = a_dst[:, h:h + 1] + a_srcT[h:h + 1, :]            # [TM, N] raw logits
        e = jnp.where(e > 0, e, NEG_SLOPE * e)                # leaky_relu
        e = e + mask_add                                      # mask non-edges
        m = jnp.max(e, axis=1, keepdims=True)
        z = e - m
        if bf16_exp:                                          # v6e/v7x: bf16 EUP exp
            p = jnp.exp(z.astype(jnp.bfloat16))
            denom = jnp.sum(p.astype(jnp.float32), axis=1, keepdims=True)
            pb = p
        else:                                                 # v5e / unknown: f32 exp
            p = jnp.exp(z)
            denom = jnp.sum(p, axis=1, keepdims=True)
            pb = p.astype(jnp.bfloat16)
        inv = pl.reciprocal(denom, approx=True)               # [TM,1] softmax denom (EUP)
        xp_h = xp[:, h * C:(h + 1) * C]                       # [N, C] bf16
        o_h = jnp.dot(pb, xp_h, preferred_element_type=jnp.float32) * inv  # [TM, C]
        if concat:
            segs.append(o_h)
        else:
            acc = o_h if acc is None else acc + o_h

    if concat:
        out = jnp.concatenate(segs, axis=1) + bias_ref[...]   # [TM, H*C], one store
    else:
        out = acc * (1.0 / float(H)) + bias_ref[...]          # mean over heads + bias
    if apply_elu:
        out = jnp.where(out > 0, out, jnp.exp(out) - 1.0)
    if apply_log_softmax:                                     # fused F.log_softmax(dim=1)
        mm = jnp.max(out, axis=1, keepdims=True)
        zz = out - mm
        out = zz - jnp.log(jnp.sum(jnp.exp(zz), axis=1, keepdims=True))
    out_ref[...] = out                                        # single lane-dense store


# ------------------------------ wrappers ------------------------------------ #

def gat_project(x, wp, attw, *, tile_m, vmem_soft_cap):
    """Hoisted per-layer projection: xp [N,H*C] bf16, a_all [N,2H] f32."""
    N, Fin = x.shape
    HC = wp.shape[1]
    H2 = attw.shape[1]
    TM = tile_m
    return pl.pallas_call(
        _project_kernel,
        grid=(N // TM,),
        in_specs=[pl.BlockSpec((TM, Fin), lambda i: (i, 0)),
                  pl.BlockSpec((Fin, HC), lambda i: (0, 0)),
                  pl.BlockSpec((Fin, H2), lambda i: (0, 0))],
        out_specs=[pl.BlockSpec((TM, HC), lambda i: (i, 0)),
                   pl.BlockSpec((TM, H2), lambda i: (i, 0))],
        out_shape=(jax.ShapeDtypeStruct((N, HC), jnp.bfloat16),
                   jax.ShapeDtypeStruct((N, H2), jnp.float32)),
        compiler_params=pltpu.CompilerParams(
            dimension_semantics=("parallel",),
            vmem_limit_bytes=_proj_vmem_bytes(N, Fin, TM, HC, H2, vmem_soft_cap)),
    )(x, wp, attw)


def gat_attention(a_dst, a_srcT, xp, mask, bias2d, *, heads, head_dim, concat,
                  apply_elu, apply_log_softmax, tile_m, bf16_exp, vmem_soft_cap):
    """Masked softmax + per-head aggregation over dst-row tiles."""
    N = a_dst.shape[0]
    H, C = heads, head_dim
    out_dim = H * C if concat else C
    TM = tile_m
    kernel = functools.partial(_gat_attn_kernel, heads=H, head_dim=C, concat=concat,
                               apply_elu=apply_elu,
                               apply_log_softmax=apply_log_softmax,
                               bf16_exp=bf16_exp)
    in_specs = [
        pl.BlockSpec((TM, H), lambda i: (i, 0)),         # a_dst tile rows
        pl.BlockSpec((H, N), lambda i: (0, 0)),          # a_srcT (layer-invariant)
        pl.BlockSpec((N, H * C), lambda i: (0, 0)),      # xp (layer-invariant, bf16)
        pl.BlockSpec((TM, N), lambda i: (i, 0)),         # adjacency tile (int8)
        pl.BlockSpec((1, out_dim), lambda i: (0, 0)),    # bias
    ]
    out_spec = pl.BlockSpec((TM, out_dim), lambda i: (i, 0))
    return pl.pallas_call(
        kernel,
        grid=(N // TM,),
        in_specs=in_specs,
        out_specs=out_spec,
        out_shape=jax.ShapeDtypeStruct((N, out_dim), jnp.float32),
        compiler_params=pltpu.CompilerParams(
            dimension_semantics=("parallel",),
            vmem_limit_bytes=_attn_vmem_bytes(N, TM, H, C, out_dim, vmem_soft_cap)),
    )(a_dst, a_srcT, xp, mask, bias2d)


def gat_conv(x, mask, W, att_src, att_dst, bias, *, concat, apply_elu,
             apply_log_softmax, tile_m, bf16_exp, vmem_soft_cap):
    """One GATConv layer. x: [N_pad, Fin], mask: [N_pad, N_pad] int8 adjacency,
    W: [H, Fin, C], att_*: [H, C], bias: [out_dim]."""
    N, Fin = x.shape
    H, _, C = W.shape
    out_dim = H * C if concat else C

    # Parameter glue (tiny, off the per-node hot path).
    wp = W.transpose(1, 0, 2).reshape(Fin, H * C).astype(jnp.bfloat16)   # [Fin, H*C]
    adst_w = jnp.einsum("hfc,hc->fh", W, att_dst)                        # [Fin, H]
    asrc_w = jnp.einsum("hfc,hc->fh", W, att_src)                        # [Fin, H]
    attw = jnp.concatenate([adst_w, asrc_w], axis=1).astype(jnp.bfloat16)  # [Fin, 2H]
    bias2d = bias.reshape(1, out_dim).astype(jnp.float32)

    # Hoisted source-side precompute: ONCE per layer, not once per dst tile.
    xp, a_all = gat_project(x, wp, attw, tile_m=tile_m, vmem_soft_cap=vmem_soft_cap)
    a_dst = a_all[:, :H]                      # [N, H]
    a_srcT = jnp.transpose(a_all[:, H:])      # [H, N]   (tiny XLA transpose)

    return gat_attention(a_dst, a_srcT, xp, mask, bias2d, heads=H, head_dim=C,
                         concat=concat, apply_elu=apply_elu,
                         apply_log_softmax=apply_log_softmax, tile_m=tile_m,
                         bf16_exp=bf16_exp, vmem_soft_cap=vmem_soft_cap)


def _glorot(key, shape):
    fan_in, fan_out = shape[-2], shape[-1]
    a = (6.0 / (fan_in + fan_out)) ** 0.5
    return jax.random.uniform(key, shape, jnp.float32, -a, a)


class GATModelPallas:
    """Mirrors GATModel.__init__ / forward with Pallas GATConv layers."""

    def __init__(self, key, in_channels, hidden_channels, out_channels,
                 num_layers=2, heads=1):
        cfgs = [(in_channels, hidden_channels, heads, True)]
        for _ in range(num_layers - 2):
            cfgs.append((hidden_channels * heads, hidden_channels, heads, True))
        cfgs.append((hidden_channels * heads, out_channels, 1, False))

        self.layers = []
        for (fin, c, h, concat) in cfgs:
            key, kw, ks, kd = jax.random.split(key, 4)
            self.layers.append(dict(
                W=_glorot(kw, (h, fin, c)),
                att_src=_glorot(ks, (h, c)),
                att_dst=_glorot(kd, (h, c)),
                bias=jnp.zeros((h * c if concat else c,), jnp.float32),  # PyG zeros-init
                concat=concat,
            ))

    def __call__(self, x, adj):
        N = x.shape[0]
        tm, n_pad = _choose_tiling(N)
        if n_pad != N:
            x = jnp.pad(x, ((0, n_pad - N), (0, 0)))
            adj = jnp.pad(adj, ((0, n_pad - N), (0, n_pad - N)))
        # 0/1 int8 adjacency; additive -inf mask is reconstructed on-chip.
        mask = (adj > 0).astype(jnp.int8)
        _, soft_cap = _vmem_caps()
        bf16_exp = _bf16_eup()

        n_layers = len(self.layers)
        for i, p in enumerate(self.layers):
            last = (i == n_layers - 1)
            x = gat_conv(x, mask, p["W"], p["att_src"], p["att_dst"], p["bias"],
                         concat=p["concat"], apply_elu=not last,
                         apply_log_softmax=last, tile_m=tm, bf16_exp=bf16_exp,
                         vmem_soft_cap=soft_cap)
        return x[:N]


if __name__ == "__main__":
    key = jax.random.PRNGKey(0)
    N, E = 64, 256
    in_ch, hid_ch, out_ch, heads, num_layers = 8, 16, 4, 2, 2

    kx, ke1, ke2, kp = jax.random.split(key, 4)
    x = jax.random.normal(kx, (N, in_ch), jnp.float32)

    # Random directed edge_index [2, E]; densified to adjacency.
    # TODO(synk): duplicate edges in edge_index are collapsed; PyG would count each.
    src = jax.random.randint(ke1, (E,), 0, N)
    dst = jax.random.randint(ke2, (E,), 0, N)
    adj = jnp.zeros((N, N), jnp.float32).at[dst, src].set(1.0)
    adj = adj.at[jnp.arange(N), jnp.arange(N)].set(1.0)  # add_self_loops=True

    model = GATModelPallas(kp, in_ch, hid_ch, out_ch,
                           num_layers=num_layers, heads=heads)
    out = model(x, adj)
    out = jax.block_until_ready(out)

    assert out.shape == (N, out_ch)
    assert bool(jnp.all(jnp.isfinite(out)))
    # rows of log_softmax must exp-sum to 1
    assert bool(jnp.allclose(jnp.sum(jnp.exp(out), axis=1), 1.0, atol=1e-4))
    print("KERNEL_OK")
</pallas_src>

<mosaic_0001>
module attributes {stable_mosaic.version = 11 : i64} {
  func.func @_project_kernel(%arg0: i32, %arg1: memref<64x8xf32, #tpu.memory_space<vmem>>, %arg2: memref<8x32xbf16, #tpu.memory_space<vmem>>, %arg3: memref<8x4xbf16, #tpu.memory_space<vmem>>, %arg4: memref<64x32xbf16, #tpu.memory_space<vmem>>, %arg5: memref<64x4xf32, #tpu.memory_space<vmem>>) attributes {dimension_semantics = [#tpu.dimension_semantics<parallel>], iteration_bounds = array<i64: 1>, scalar_prefetch = 0 : i64, scratch_operands = 0 : i64, tpu.core_type = #tpu.core_type<tc>, window_params = [{transform_indices = @transform_0, window_bounds = array<i64: 64, 8>}, {pipeline_mode = #tpu.pipeline_mode<synchronous>, transform_indices = @transform_1, window_bounds = array<i64: 8, 32>}, {pipeline_mode = #tpu.pipeline_mode<synchronous>, transform_indices = @transform_2, window_bounds = array<i64: 8, 4>}, {transform_indices = @transform_3, window_bounds = array<i64: 64, 32>}, {transform_indices = @transform_4, window_bounds = array<i64: 64, 4>}]} {
    %c0 = arith.constant 0 : index
    %c0_0 = arith.constant 0 : index
    %0 = vector.load %arg1[%c0, %c0_0] : memref<64x8xf32, #tpu.memory_space<vmem>>, vector<64x8xf32>
    %1 = arith.truncf %0 : vector<64x8xf32> to vector<64x8xbf16>
    %c0_1 = arith.constant 0 : index
    %c0_2 = arith.constant 0 : index
    %2 = vector.load %arg2[%c0_1, %c0_2] : memref<8x32xbf16, #tpu.memory_space<vmem>>, vector<8x32xbf16>
    %cst = arith.constant dense<0.000000e+00> : vector<64x32xf32>
    %3 = tpu.matmul %1, %2, %cst {dimension_numbers = #tpu.dot_dimension_numbers<[1], [0], [0], [1], [0, 0, 1, 1], [], []>} : vector<64x8xbf16>, vector<8x32xbf16>, vector<64x32xf32> -> vector<64x32xf32>
    %4 = arith.truncf %3 : vector<64x32xf32> to vector<64x32xbf16>
    %c0_3 = arith.constant 0 : index
    %c0_4 = arith.constant 0 : index
    %5 = vector.load %arg4[%c0_3, %c0_4] : memref<64x32xbf16, #tpu.memory_space<vmem>>, vector<64x32xbf16>
    tpu.vector_store %arg4[%c0_3, %c0_4], %4 {strides = array<i32>} : memref<64x32xbf16, #tpu.memory_space<vmem>>, vector<64x32xbf16>,
    %c0_5 = arith.constant 0 : index
    %c0_6 = arith.constant 0 : index
    %6 = vector.load %arg3[%c0_5, %c0_6] : memref<8x4xbf16, #tpu.memory_space<vmem>>, vector<8x4xbf16>
    %cst_7 = arith.constant dense<0.000000e+00> : vector<64x4xf32>
    %7 = tpu.matmul %1, %6, %cst_7 {dimension_numbers = #tpu.dot_dimension_numbers<[1], [0], [0], [1], [0, 0, 1, 1], [], []>} : vector<64x8xbf16>, vector<8x4xbf16>, vector<64x4xf32> -> vector<64x4xf32>
    %c0_8 = arith.constant 0 : index
    %c0_9 = arith.constant 0 : index
    %8 = vector.load %arg5[%c0_8, %c0_9] : memref<64x4xf32, #tpu.memory_space<vmem>>, vector<64x4xf32>
    tpu.vector_store %arg5[%c0_8, %c0_9], %7 {strides = array<i32>} : memref<64x4xf32, #tpu.memory_space<vmem>>, vector<64x4xf32>,
    return
  }
  func.func @transform_0(%arg0: i32) -> (i32, i32) {
    %c0_i32 = arith.constant 0 : i32
    %c0_i32_0 = arith.constant 0 : i32
    return %arg0, %c0_i32 : i32, i32
  }
  func.func @transform_1(%arg0: i32) -> (i32, i32) {
    %c0_i32 = arith.constant 0 : i32
    %c0_i32_0 = arith.constant 0 : i32
    %c0_i32_1 = arith.constant 0 : i32
    return %c0_i32, %c0_i32_0 : i32, i32
  }
  func.func @transform_2(%arg0: i32) -> (i32, i32) {
    %c0_i32 = arith.constant 0 : i32
    %c0_i32_0 = arith.constant 0 : i32
    %c0_i32_1 = arith.constant 0 : i32
    return %c0_i32, %c0_i32_0 : i32, i32
  }
  func.func @transform_3(%arg0: i32) -> (i32, i32) {
    %c0_i32 = arith.constant 0 : i32
    %c0_i32_0 = arith.constant 0 : i32
    return %arg0, %c0_i32 : i32, i32
  }
  func.func @transform_4(%arg0: i32) -> (i32, i32) {
    %c0_i32 = arith.constant 0 : i32
    %c0_i32_0 = arith.constant 0 : i32
    return %arg0, %c0_i32 : i32, i32
  }
}

</mosaic_0001>

<bundles_post_ra>
// kernel: tpu_custom_call.1
= control target key start
LH: loop header
LB: loop body
LE: loop exit
PB: predicated region body
PF: predicated region fallthrough
CT: control target
= control target key end

     0   :  { %vm43_vm0 = vcmask 1043456   ;;  %vm30_vm1 = vcmask 64512   ;;  %vm126_vm2 = vcmask 31744   ;;  %vm84_vm3 = vcmask 257024   ;;  %s280_s1 = inlined_call_operand.vmem [shape: bf16[8,32], index: 1, kind: input, shape index: {}]   ;;  %s281_s2 = inlined_call_operand.vmem [shape: bf16[8,4], index: 2, kind: input, shape index: {}]   ;;  %s282_s0 = inlined_call_operand.vmem [shape: f32[64,8], index: 0, kind: input, shape index: {}]   ;;  %s283_s4 = inlined_call_operand.vmem [shape: f32[64,4], index: 4, kind: output, shape index: {1}]   ;;  %s284_s3 = inlined_call_operand.vmem [shape: bf16[64,32], index: 3, kind: output, shape index: {0}]  }
   0x1   :  { %v29_v0 = vld [vmem:[%s280_s1] sm:$0xf]  ;;  %v18_v5 = vld [vmem:[%s282_s0 + $0x8] sm:$0xff]  ;;  %v19_v10 = vld [vmem:[%s282_s0 + $0x10] sm:$0xff] }
   0x2   :  { %v93_v1 = vld [vmem:[%s281_s2] sm:$0xf]  ;;  %v45_v3 = vsel %vm43_vm0, %v29_v0, 0  ;;  %v22_v7 = vld [vmem:[%s282_s0 + $0x28] sm:$0xff]  ;;  %v20_v11 = vld [vmem:[%s282_s0 + $0x18] sm:$0xff] }
   0x3   :  { %v17_v2 = vld [vmem:[%s282_s0] sm:$0xff]  ;;  %v95_v4 = vsel %vm43_vm0, %v93_v1, 0  ;;  %54 = vmatpush.bf16.msra.mxu0 %v45_v3  ;;  %151 = vmatpush.bf16.msra.mxu2 %v45_v3  ;;  %v23_v12 = vld [vmem:[%s282_s0 + $0x30] sm:$0xff]  ;;  %v24_v13 = vld [vmem:[%s282_s0 + $0x38] sm:$0xff]  ;;  %v26_v14 = vpack.c.bf16 %v20_v11, %v19_v10 }
   0x4   :  { %v21_v6 = vld [vmem:[%s282_s0 + $0x20] sm:$0xff]  ;;  %v25_v8 = vpack.c.bf16 %v18_v5, %v17_v2  ;;  %104 = vmatpush.bf16.msra.mxu1 %v95_v4  ;;  %152 = vmatpush.bf16.msra.mxu3 %v95_v4  ;;  %v28_v15 = vpack.c.bf16 %v24_v13, %v23_v12 }
   0x5   :  { %v27_v9 = vpack.c.bf16 %v22_v7, %v21_v6 }
   0x6   :  { %143 = vmatmul.msk.bf16.vlgmr.msra.gmra.mxu0 %vm30_vm1, %v25_v8 }
   0x7   :  { %145 = vmatmul.msk.bf16.vlgmr.msra.gmra.mxu2 %vm30_vm1, %v27_v9  ;;  %147 = vmatmul.msk.bf16.vlgmr.msra.gmra.mxu1 %vm30_vm1, %v25_v8 }
   0x8   :  { %149 = vmatmul.msk.bf16.vlgmr.msra.gmra.mxu3 %vm30_vm1, %v27_v9 }
  0x16   :  { %144 = vmatmul.msk.bf16.gmra.mxu0 %vm30_vm1, %v26_v14 }
  0x17   :  { %146 = vmatmul.msk.bf16.gmra.mxu2 %vm30_vm1, %v28_v15  ;;  %148 = vmatmul.msk.bf16.gmra.mxu1 %vm30_vm1, %v26_v14 }
  0x18   :  { %150 = vmatmul.msk.bf16.gmra.mxu3 %vm30_vm1, %v28_v15 }
  0x83   :  { %v56_v16 = vpop.f32.mrf.mxu0 }
  0x84   :  { %v76_v17 = vpack.c.bf16 %v56_v16, %v56_v16  ;;  %v106_v18 = vpop.f32.mrf.mxu1 }
  0x85   :  { %127 = vst.msk [vmem:[%s283_s4] sm:$0xff] %vm126_vm2, %v106_v18 }
  0x86   :  { %85 = vst.msk [vmem:[%s284_s3] sm:$0xf] %vm84_vm3, %v76_v17 }
  0x8a   :  { %v66_v19 = vpop.f32.mrf.mxu2 }
  0x8b   :  { %v80_v20 = vpack.c.bf16 %v66_v19, %v66_v19  ;;  %v116_v21 = vpop.f32.mrf.mxu3  ;;  %v58_v22 = vpop.f32.mrf.mxu0 }
  0x8c   :  { %131 = vst.msk [vmem:[%s283_s4 + $0x20] sm:$0xff] %vm126_vm2, %v116_v21  ;;  %v77_v23 = vpack.c.bf16 %v58_v22, %v58_v22  ;;  %v108_v24 = vpop.f32.mrf.mxu1 }
  0x8d   :  { %89 = vst.msk [vmem:[%s284_s3 + $0x10] sm:$0xf] %vm84_vm3, %v80_v20 }
  0x8e   :  { %128 = vst.msk [vmem:[%s283_s4 + $0x8] sm:$0xff] %vm126_vm2, %v108_v24 }
  0x8f   :  { %86 = vst.msk [vmem:[%s284_s3 + $0x4] sm:$0xf] %vm84_vm3, %v77_v23 }
  0x92   :  { %v68_v25 = vpop.f32.mrf.mxu2 }
  0x93   :  { %v81_v26 = vpack.c.bf16 %v68_v25, %v68_v25  ;;  %v118_v27 = vpop.f32.mrf.mxu3  ;;  %v61_v28 = vpop.f32.mrf.mxu0 }
  0x94   :  { %132 = vst.msk [vmem:[%s283_s4 + $0x28] sm:$0xff] %vm126_vm2, %v118_v27  ;;  %v78_v29 = vpack.c.bf16 %v61_v28, %v61_v28  ;;  %v111_v30 = vpop.f32.mrf.mxu1 }
  0x95   :  { %90 = vst.msk [vmem:[%s284_s3 + $0x14] sm:$0xf] %vm84_vm3, %v81_v26 }
  0x96   :  { %129 = vst.msk [vmem:[%s283_s4 + $0x10] sm:$0xff] %vm126_vm2, %v111_v30 }
  0x97   :  { %87 = vst.msk [vmem:[%s284_s3 + $0x8] sm:$0xf] %vm84_vm3, %v78_v29 }
  0x9a   :  { %v71_v31 = vpop.f32.mrf.mxu2 }
  0x9b   :  { %v82_v32 = vpack.c.bf16 %v71_v31, %v71_v31  ;;  %v121_v33 = vpop.f32.mrf.mxu3  ;;  %v63_v34 = vpop.f32.mrf.mxu0 }
  0x9c   :  { %133 = vst.msk [vmem:[%s283_s4 + $0x30] sm:$0xff] %vm126_vm2, %v121_v33  ;;  %v79_v35 = vpack.c.bf16 %v63_v34, %v63_v34  ;;  %v113_v36 = vpop.f32.mrf.mxu1 }
  0x9d   :  { %91 = vst.msk [vmem:[%s284_s3 + $0x18] sm:$0xf] %vm84_vm3, %v82_v32 }
  0x9e   :  { %130 = vst.msk [vmem:[%s283_s4 + $0x18] sm:$0xff] %vm126_vm2, %v113_v36 }
  0x9f   :  { %88 = vst.msk [vmem:[%s284_s3 + $0xc] sm:$0xf] %vm84_vm3, %v79_v35 }
  0xa2   :  { %v73_v37 = vpop.f32.mrf.mxu2 }
  0xa3   :  { %v83_v38 = vpack.c.bf16 %v73_v37, %v73_v37  ;;  %v123_v39 = vpop.f32.mrf.mxu3 }
  0xa4   :  { %134 = vst.msk [vmem:[%s283_s4 + $0x38] sm:$0xff] %vm126_vm2, %v123_v39 }
  0xa5   :  { %92 = vst.msk [vmem:[%s284_s3 + $0x1c] sm:$0xf] %vm84_vm3, %v83_v38 }

</bundles_post_ra>
